<compile_context>
chip_gen: v7x
topology: tpu7x:2x2x1
jax: 0.10.0
libtpu: 0.0.40
codegen_flags: <defaults>
</compile_context>

<pallas_src>
from typing import NamedTuple, List

import jax
import jax.numpy as jnp
import numpy as np
from jax.experimental import pallas as pl
from jax.experimental.pallas import tpu as pltpu


# ----------------------------------------------------------------------------
# Fused Pallas kernel: all tree depths in one grid, state resident in VMEM.
# ----------------------------------------------------------------------------
def _fused_tree_lstm_kernel(hid_ref,                       # SMEM [depth*K*N] i32
                            xw_ref, u_ref, hxh_ref, hxc_ref,
                            h_out_ref, c_out_ref,
                            h_st, c_st, h_ch, c_ch):
    d = pl.program_id(0)
    N, H = h_out_ref.shape                  # nodes per depth (mult. of 8), hidden
    KN = h_ch.shape[0]                      # K * N gathered child rows
    K = KN // N

    # ---- depth 0: initialize the resident state slab -----------------------
    #   rows [0, N)      : previous-depth node states (start at 0)
    #   row  N           : hx (hidden_idx == -1 resolves here)
    #   rows N+1 .. N+7  : sublane padding (zeros, never selected)
    @pl.when(d == 0)
    def _():
        h_st[0:N, :] = jnp.zeros((N, H), jnp.float32)
        c_st[0:N, :] = jnp.zeros((N, H), jnp.float32)
        h_st[N:N + 8, :] = hxh_ref[...]
        c_st[N:N + 8, :] = hxc_ref[...]

    # ---- child gather: scalar-indexed row copies out of the state slab -----
    base = d * KN
    for r in range(KN):                     # static unroll; row r = child k*N + n
        idx = hid_ref[base + r]             # node row, or N for hx / padding
        h_ch[pl.ds(r, 1), :] = h_st[pl.ds(idx, 1), :]
        c_ch[pl.ds(r, 1), :] = c_st[pl.ds(idx, 1), :]

    # ---- the only in-loop matmul: gathered children @ U ([i|o|u|f] packed) --
    hu = jnp.dot(h_ch[...].astype(jnp.bfloat16), u_ref[...],
                 preferred_element_type=jnp.float32)         # [K*N, 4H] f32

    xw = xw_ref[...]                                         # [N, 4H], bias folded in
    hu_k = [hu[k * N:(k + 1) * N, :] for k in range(K)]      # sublane-aligned slices
    hu_sum = hu_k[0]
    for k in range(1, K):
        hu_sum = hu_sum + hu_k[k]

    pre = xw + hu_sum                                        # one full 128-lane add
    i_g = jax.nn.sigmoid(pre[:, 0 * H:1 * H])
    o_g = jax.nn.sigmoid(pre[:, 1 * H:2 * H])
    u_g = jnp.tanh(pre[:, 2 * H:3 * H])

    f_x = xw[:, 3 * H:4 * H]                                 # W_f x + b_f
    c_new = i_g * u_g
    for k in range(K):                                       # static unroll over children
        f_k = jax.nn.sigmoid(f_x + hu_k[k][:, 3 * H:4 * H])
        c_new = c_new + f_k * c_ch[k * N:(k + 1) * N, :]
    h_new = o_g * jnp.tanh(c_new)

    # ---- update resident state; write outputs only at the final depth ------
    h_st[0:N, :] = h_new
    c_st[0:N, :] = c_new

    @pl.when(d == pl.num_programs(0) - 1)
    def _():
        h_out_ref[...] = h_new
        c_out_ref[...] = c_new


# ----------------------------------------------------------------------------
# Packed tree (mirrors packed_tree.{tree_idx, word_idx, hidden_idx, depth})
# ----------------------------------------------------------------------------
class PackedTree(NamedTuple):
    tree_idx: List[jnp.ndarray]    # carried for interface fidelity (unused)
    word_idx: List[jnp.ndarray]    # [depth] of int32 [N_pad]; -2 => zero embedding
    hidden_idx: List[jnp.ndarray]  # [depth] of int32 [N_pad, K]; -1 => hx
    depth: int


# ----------------------------------------------------------------------------
# Forward: single pallas_call over the depth grid.
# ----------------------------------------------------------------------------
def tree_lstm_forward(x, packed: PackedTree, params, hx=None):
    H = params["u_f"].shape[0]
    depth = packed.depth
    N = int(packed.word_idx[0].shape[0])
    K = int(packed.hidden_idx[0].shape[1])
    assert N % 8 == 0, "node padding must be a multiple of 8 (sublane tile)"

    if hx is None:
        hx = (jnp.zeros((1, H), jnp.float32), jnp.zeros((1, H), jnp.float32))

    # ---------------- one-time prep (outside the recurrence) ----------------
    w_idx = jnp.stack(packed.word_idx)                          # [depth, N]
    hid = jnp.stack(packed.hidden_idx)                          # [depth, N, K]

    # embedding gather with -2 -> zero row (done once for every depth)
    mask = (w_idx != -2)
    safe_w = jnp.where(mask, w_idx, 0)
    x_all = jnp.where(mask[..., None], x[safe_w], 0.0).astype(jnp.float32)  # [depth,N,E]

    # gather indices: child c >= 0 -> state row c; -1 (hx / padding) -> row N.
    # Flattened as [depth, K, N] so kernel row r = k*N + n matches hu_k slices.
    hid_flat = jnp.where(hid >= 0, hid, N).astype(jnp.int32)
    hid_flat = jnp.transpose(hid_flat, (0, 2, 1)).reshape(depth * K * N)

    # packed gate weights, columns [i | o | u | f] -> 4*H contiguous lanes
    W_all = jnp.concatenate([params["w_iou"], params["w_f"]], axis=1)   # [E, 4H]
    U_all = jnp.concatenate([params["u_iou"], params["u_f"]], axis=1)   # [H, 4H]
    b_all = jnp.concatenate([params["b_iou"], params["b_f"]], axis=1)   # [1, 4H]

    # x @ W + b has no h/c dependence: precompute for all depths at once
    xw_all = jnp.einsum("dne,ef->dnf", x_all, W_all) + b_all            # [depth,N,4H]

    U_bf16 = U_all.astype(jnp.bfloat16)                                 # [H, 4H] bf16

    hx_h = jnp.zeros((8, H), jnp.float32).at[0, :].set(hx[0][0])
    hx_c = jnp.zeros((8, H), jnp.float32).at[0, :].set(hx[1][0])

    # ---------------- fused pallas_call over the depth grid -----------------
    grid_spec = pltpu.PrefetchScalarGridSpec(
        num_scalar_prefetch=1,                                   # hid_flat -> SMEM
        grid=(depth,),
        in_specs=[
            pl.BlockSpec((None, N, 4 * H), lambda d, hid: (d, 0, 0)),   # xw_all (per depth)
            pl.BlockSpec((H, 4 * H), lambda d, hid: (0, 0)),            # U      (resident)
            pl.BlockSpec((8, H), lambda d, hid: (0, 0)),                # hx_h   (resident)
            pl.BlockSpec((8, H), lambda d, hid: (0, 0)),                # hx_c   (resident)
        ],
        out_specs=(pl.BlockSpec((N, H), lambda d, hid: (0, 0)),
                   pl.BlockSpec((N, H), lambda d, hid: (0, 0))),
        scratch_shapes=[pltpu.VMEM((N + 8, H), jnp.float32),            # h state slab
                        pltpu.VMEM((N + 8, H), jnp.float32),            # c state slab
                        pltpu.VMEM((K * N, H), jnp.float32),            # gathered h_ch
                        pltpu.VMEM((K * N, H), jnp.float32)],           # gathered c_ch
    )

    # cost model: one [K*N,H]x[H,4H] matmul + elementwise per depth
    flops = depth * (2 * (K * N) * H * (4 * H) + 16 * N * 4 * H)
    transcendentals = depth * N * H * (K + 4)
    bytes_accessed = int(4 * (xw_all.size + hx_h.size + hx_c.size + 2 * N * H)
                         + 2 * U_bf16.size + 4 * hid_flat.size)

    # VMEM budget from actual resident + double-buffered blocks (v7x-safe cap)
    vmem_need = (2 * (N * 4 * H * 4)            # double-buffered xw block
                 + 2 * (U_bf16.size * 2)        # resident U (bf16, x2 buffers)
                 + 2 * 2 * 8 * H * 4            # hx blocks
                 + 2 * (N + 8) * H * 4          # state slabs
                 + 2 * (K * N) * H * 4          # gather buffers
                 + 2 * 2 * N * H * 4)           # output blocks
    vmem_limit = int(min(max(2 * vmem_need, 16 << 20), 48 << 20))

    h_out, c_out = pl.pallas_call(
        _fused_tree_lstm_kernel,
        out_shape=(jax.ShapeDtypeStruct((N, H), jnp.float32),
                   jax.ShapeDtypeStruct((N, H), jnp.float32)),
        grid_spec=grid_spec,
        compiler_params=pltpu.CompilerParams(
            # TODO(synk): add a leading "parallel" tree/batch grid axis (per-core
            # state slabs) to occupy both v7x TensorCores when batching trees.
            dimension_semantics=("arbitrary",),          # sequential over depth
            vmem_limit_bytes=vmem_limit),
        cost_estimate=pl.CostEstimate(flops=flops,
                                      transcendentals=transcendentals,
                                      bytes_accessed=bytes_accessed),
    )(hid_flat, xw_all, U_bf16, hx_h, hx_c)

    # p_dropout == 0.0 -> dropout is identity.
    return h_out, c_out


# ----------------------------------------------------------------------------
# Pure-JAX reference of the same reconstructed cell (for verification).
# ----------------------------------------------------------------------------
def tree_lstm_reference(x, packed: PackedTree, params, hx=None):
    H = params["u_f"].shape[0]
    N = packed.word_idx[0].shape[0]
    if hx is None:
        hx = (jnp.zeros((1, H), jnp.float32), jnp.zeros((1, H), jnp.float32))
    h_nodes = jnp.zeros((N, H), jnp.float32)
    c_nodes = jnp.zeros((N, H), jnp.float32)
    for d in range(packed.depth):
        w = packed.word_idx[d]
        mask = (w != -2)
        x_d = jnp.where(mask[:, None], x[jnp.where(mask, w, 0)], 0.0)
        hid = packed.hidden_idx[d]
        h_pool = jnp.concatenate([h_nodes, hx[0]], axis=0)
        c_pool = jnp.concatenate([c_nodes, hx[1]], axis=0)
        sel = jnp.where(hid >= 0, hid, N)
        h_ch = h_pool[sel]                                   # [N, K, H]
        c_ch = c_pool[sel]
        h_sum = h_ch.sum(axis=1)
        iou = x_d @ params["w_iou"] + h_sum @ params["u_iou"] + params["b_iou"]
        i_g = jax.nn.sigmoid(iou[:, :H])
        o_g = jax.nn.sigmoid(iou[:, H:2 * H])
        u_g = jnp.tanh(iou[:, 2 * H:])
        f_pre = (x_d @ params["w_f"] + params["b_f"])[:, None, :] + h_ch @ params["u_f"]
        c_nodes = i_g * u_g + (jax.nn.sigmoid(f_pre) * c_ch).sum(axis=1)
        h_nodes = o_g * jnp.tanh(c_nodes)
    return h_nodes, c_nodes


# ----------------------------------------------------------------------------
# Deterministic parameter init (Xavier-uniform weights, zero biases)
# ----------------------------------------------------------------------------
def init_params(key, embedding_size, hidden_size):
    def xavier(k, shape):
        fan_in, fan_out = shape
        bound = float(np.sqrt(6.0 / (fan_in + fan_out)))
        return jax.random.uniform(k, shape, jnp.float32, -bound, bound)

    k1, k2, k3, k4 = jax.random.split(key, 4)
    E, H = embedding_size, hidden_size
    return {
        "w_iou": xavier(k1, (E, 3 * H)),
        "u_iou": xavier(k2, (H, 3 * H)),
        "b_iou": jnp.zeros((1, 3 * H), jnp.float32),
        "w_f":   xavier(k3, (E, H)),
        "u_f":   xavier(k4, (H, H)),
        "b_f":   jnp.zeros((1, H), jnp.float32),
    }


# ----------------------------------------------------------------------------
# Small deterministic packed tree:
#   depth 0: 4 leaves (word idx 1..4), children = -1 (hx)
#   depth 1: 2 internal nodes (-2 -> zero embedding), children = leaf pairs
#   depth 2: 1 root node, children = the two internal nodes
# Every depth padded to N_pad=8 nodes (pad word idx = -2, pad child idx = -1).
# ----------------------------------------------------------------------------
def make_packed_tree(n_pad=8, k=2):
    def pad_w(vals):
        out = np.full((n_pad,), -2, np.int32)
        out[:len(vals)] = vals
        return jnp.asarray(out)

    def pad_h(rows):
        out = np.full((n_pad, k), -1, np.int32)
        for i, r in enumerate(rows):
            out[i, :len(r)] = r
        return jnp.asarray(out)

    word_idx = [pad_w([1, 2, 3, 4]), pad_w([-2, -2]), pad_w([-2])]
    hidden_idx = [pad_h([[], [], [], []]),
                  pad_h([[0, 1], [2, 3]]),
                  pad_h([[0, 1]])]
    tree_idx = [jnp.arange(n_pad, dtype=jnp.int32) for _ in range(3)]
    return PackedTree(tree_idx=tree_idx, word_idx=word_idx,
                      hidden_idx=hidden_idx, depth=3)


if __name__ == "__main__":
    embedding_size, hidden_size, vocab_size = 16, 32, 50
    seq = 8

    key = jax.random.PRNGKey(0)
    kx, kp = jax.random.split(key)
    x = jax.random.normal(kx, (seq, embedding_size), jnp.float32)
    params = init_params(kp, embedding_size, hidden_size)
    packed = make_packed_tree()

    h, c = tree_lstm_forward(x, packed, params)
    jax.block_until_ready((h, c))

    h_ref, c_ref = tree_lstm_reference(x, packed, params)

    assert h.shape == (8, hidden_size) and c.shape == (8, hidden_size)
    assert bool(jnp.all(jnp.isfinite(h))) and bool(jnp.all(jnp.isfinite(c)))
    assert bool(jnp.allclose(h, h_ref, rtol=1e-2, atol=1e-2))
    assert bool(jnp.allclose(c, c_ref, rtol=1e-2, atol=1e-2))
    print("KERNEL_OK")
</pallas_src>

<mosaic_0001>
module attributes {stable_mosaic.version = 11 : i64} {
  func.func @_fused_tree_lstm_kernel(%arg0: i32, %arg1: memref<48xi32, #tpu.memory_space<smem>>, %arg2: memref<1x8x128xf32, #tpu.memory_space<vmem>>, %arg3: memref<32x128xbf16, #tpu.memory_space<vmem>>, %arg4: memref<8x32xf32, #tpu.memory_space<vmem>>, %arg5: memref<8x32xf32, #tpu.memory_space<vmem>>, %arg6: memref<8x32xf32, #tpu.memory_space<vmem>>, %arg7: memref<8x32xf32, #tpu.memory_space<vmem>>, %arg8: memref<16x32xf32, #tpu.memory_space<vmem>>, %arg9: memref<16x32xf32, #tpu.memory_space<vmem>>, %arg10: memref<16x32xf32, #tpu.memory_space<vmem>>, %arg11: memref<16x32xf32, #tpu.memory_space<vmem>>) attributes {dimension_semantics = [#tpu.dimension_semantics<arbitrary>], iteration_bounds = array<i64: 3>, scalar_prefetch = 1 : i64, scratch_operands = 4 : i64, tpu.core_type = #tpu.core_type<tc>, window_params = [{transform_indices = @transform_0, window_bounds = array<i64: 1, 8, 128>}, {pipeline_mode = #tpu.pipeline_mode<synchronous>, transform_indices = @transform_1, window_bounds = array<i64: 32, 128>}, {pipeline_mode = #tpu.pipeline_mode<synchronous>, transform_indices = @transform_2, window_bounds = array<i64: 8, 32>}, {pipeline_mode = #tpu.pipeline_mode<synchronous>, transform_indices = @transform_3, window_bounds = array<i64: 8, 32>}, {pipeline_mode = #tpu.pipeline_mode<synchronous>, transform_indices = @transform_4, window_bounds = array<i64: 8, 32>}, {pipeline_mode = #tpu.pipeline_mode<synchronous>, transform_indices = @transform_5, window_bounds = array<i64: 8, 32>}]} {
    %c0_i32 = arith.constant 0 : i32
    %0 = arith.cmpi eq, %arg0, %c0_i32 : i32
    %1 = arith.extui %0 : i1 to i32
    %c0_i32_0 = arith.constant 0 : i32
    %2 = arith.cmpi ne, %1, %c0_i32_0 : i32
    scf.if %2 {
      %cst_103 = arith.constant 0.000000e+00 : f32
      %201 = vector.broadcast %cst_103 : f32 to vector<8x32xf32>
      %c0_104 = arith.constant 0 : index
      %c0_105 = arith.constant 0 : index
      %202 = vector.load %arg8[%c0_104, %c0_105] : memref<16x32xf32, #tpu.memory_space<vmem>>, vector<8x32xf32>
      tpu.vector_store %arg8[%c0_104, %c0_105], %201 {strides = array<i32>} : memref<16x32xf32, #tpu.memory_space<vmem>>, vector<8x32xf32>,
      %cst_106 = arith.constant 0.000000e+00 : f32
      %203 = vector.broadcast %cst_106 : f32 to vector<8x32xf32>
      %c0_107 = arith.constant 0 : index
      %c0_108 = arith.constant 0 : index
      %204 = vector.load %arg9[%c0_107, %c0_108] : memref<16x32xf32, #tpu.memory_space<vmem>>, vector<8x32xf32>
      tpu.vector_store %arg9[%c0_107, %c0_108], %203 {strides = array<i32>} : memref<16x32xf32, #tpu.memory_space<vmem>>, vector<8x32xf32>,
      %c0_109 = arith.constant 0 : index
      %c0_110 = arith.constant 0 : index
      %205 = vector.load %arg4[%c0_109, %c0_110] : memref<8x32xf32, #tpu.memory_space<vmem>>, vector<8x32xf32>
      %c8_111 = arith.constant 8 : index
      %c0_112 = arith.constant 0 : index
      %206 = vector.load %arg8[%c8_111, %c0_112] : memref<16x32xf32, #tpu.memory_space<vmem>>, vector<8x32xf32>
      tpu.vector_store %arg8[%c8_111, %c0_112], %205 {strides = array<i32>} : memref<16x32xf32, #tpu.memory_space<vmem>>, vector<8x32xf32>,
      %c0_113 = arith.constant 0 : index
      %c0_114 = arith.constant 0 : index
      %207 = vector.load %arg5[%c0_113, %c0_114] : memref<8x32xf32, #tpu.memory_space<vmem>>, vector<8x32xf32>
      %c8_115 = arith.constant 8 : index
      %c0_116 = arith.constant 0 : index
      %208 = vector.load %arg9[%c8_115, %c0_116] : memref<16x32xf32, #tpu.memory_space<vmem>>, vector<8x32xf32>
      tpu.vector_store %arg9[%c8_115, %c0_116], %207 {strides = array<i32>} : memref<16x32xf32, #tpu.memory_space<vmem>>, vector<8x32xf32>,
    } else {
    }
    %c16_i32 = arith.constant 16 : i32
    %3 = arith.muli %arg0, %c16_i32 : i32
    %c0_i32_1 = arith.constant 0 : i32
    %4 = arith.addi %3, %c0_i32_1 : i32
    %5 = arith.index_cast %4 : i32 to index
    %6 = memref.load %arg1[%5] : memref<48xi32, #tpu.memory_space<smem>>
    %7 = arith.index_cast %6 : i32 to index
    %c0 = arith.constant 0 : index
    %8 = vector.load %arg8[%7, %c0] : memref<16x32xf32, #tpu.memory_space<vmem>>, vector<1x32xf32>
    %c0_2 = arith.constant 0 : index
    %c0_3 = arith.constant 0 : index
    %9 = vector.load %arg10[%c0_2, %c0_3] : memref<16x32xf32, #tpu.memory_space<vmem>>, vector<1x32xf32>
    tpu.vector_store %arg10[%c0_2, %c0_3], %8 {strides = array<i32>} : memref<16x32xf32, #tpu.memory_space<vmem>>, vector<1x32xf32>,
    %10 = arith.index_cast %6 : i32 to index
    %c0_4 = arith.constant 0 : index
    %11 = vector.load %arg9[%10, %c0_4] : memref<16x32xf32, #tpu.memory_space<vmem>>, vector<1x32xf32>
    %c0_5 = arith.constant 0 : index
    %c0_6 = arith.constant 0 : index
    %12 = vector.load %arg11[%c0_5, %c0_6] : memref<16x32xf32, #tpu.memory_space<vmem>>, vector<1x32xf32>
    tpu.vector_store %arg11[%c0_5, %c0_6], %11 {strides = array<i32>} : memref<16x32xf32, #tpu.memory_space<vmem>>, vector<1x32xf32>,
    %c1_i32 = arith.constant 1 : i32
    %13 = arith.addi %3, %c1_i32 : i32
    %14 = arith.index_cast %13 : i32 to index
    %15 = memref.load %arg1[%14] : memref<48xi32, #tpu.memory_space<smem>>
    %16 = arith.index_cast %15 : i32 to index
    %c0_7 = arith.constant 0 : index
    %17 = vector.load %arg8[%16, %c0_7] : memref<16x32xf32, #tpu.memory_space<vmem>>, vector<1x32xf32>
    %c1 = arith.constant 1 : index
    %c0_8 = arith.constant 0 : index
    %18 = vector.load %arg10[%c1, %c0_8] : memref<16x32xf32, #tpu.memory_space<vmem>>, vector<1x32xf32>
    tpu.vector_store %arg10[%c1, %c0_8], %17 {strides = array<i32>} : memref<16x32xf32, #tpu.memory_space<vmem>>, vector<1x32xf32>,
    %19 = arith.index_cast %15 : i32 to index
    %c0_9 = arith.constant 0 : index
    %20 = vector.load %arg9[%19, %c0_9] : memref<16x32xf32, #tpu.memory_space<vmem>>, vector<1x32xf32>
    %c1_10 = arith.constant 1 : index
    %c0_11 = arith.constant 0 : index
    %21 = vector.load %arg11[%c1_10, %c0_11] : memref<16x32xf32, #tpu.memory_space<vmem>>, vector<1x32xf32>
    tpu.vector_store %arg11[%c1_10, %c0_11], %20 {strides = array<i32>} : memref<16x32xf32, #tpu.memory_space<vmem>>, vector<1x32xf32>,
    %c2_i32 = arith.constant 2 : i32
    %22 = arith.addi %3, %c2_i32 : i32
    %23 = arith.index_cast %22 : i32 to index
    %24 = memref.load %arg1[%23] : memref<48xi32, #tpu.memory_space<smem>>
    %25 = arith.index_cast %24 : i32 to index
    %c0_12 = arith.constant 0 : index
    %26 = vector.load %arg8[%25, %c0_12] : memref<16x32xf32, #tpu.memory_space<vmem>>, vector<1x32xf32>
    %c2 = arith.constant 2 : index
    %c0_13 = arith.constant 0 : index
    %27 = vector.load %arg10[%c2, %c0_13] : memref<16x32xf32, #tpu.memory_space<vmem>>, vector<1x32xf32>
    tpu.vector_store %arg10[%c2, %c0_13], %26 {strides = array<i32>} : memref<16x32xf32, #tpu.memory_space<vmem>>, vector<1x32xf32>,
    %28 = arith.index_cast %24 : i32 to index
    %c0_14 = arith.constant 0 : index
    %29 = vector.load %arg9[%28, %c0_14] : memref<16x32xf32, #tpu.memory_space<vmem>>, vector<1x32xf32>
    %c2_15 = arith.constant 2 : index
    %c0_16 = arith.constant 0 : index
    %30 = vector.load %arg11[%c2_15, %c0_16] : memref<16x32xf32, #tpu.memory_space<vmem>>, vector<1x32xf32>
    tpu.vector_store %arg11[%c2_15, %c0_16], %29 {strides = array<i32>} : memref<16x32xf32, #tpu.memory_space<vmem>>, vector<1x32xf32>,
    %c3_i32 = arith.constant 3 : i32
    %31 = arith.addi %3, %c3_i32 : i32
    %32 = arith.index_cast %31 : i32 to index
    %33 = memref.load %arg1[%32] : memref<48xi32, #tpu.memory_space<smem>>
    %34 = arith.index_cast %33 : i32 to index
    %c0_17 = arith.constant 0 : index
    %35 = vector.load %arg8[%34, %c0_17] : memref<16x32xf32, #tpu.memory_space<vmem>>, vector<1x32xf32>
    %c3 = arith.constant 3 : index
    %c0_18 = arith.constant 0 : index
    %36 = vector.load %arg10[%c3, %c0_18] : memref<16x32xf32, #tpu.memory_space<vmem>>, vector<1x32xf32>
    tpu.vector_store %arg10[%c3, %c0_18], %35 {strides = array<i32>} : memref<16x32xf32, #tpu.memory_space<vmem>>, vector<1x32xf32>,
    %37 = arith.index_cast %33 : i32 to index
    %c0_19 = arith.constant 0 : index
    %38 = vector.load %arg9[%37, %c0_19] : memref<16x32xf32, #tpu.memory_space<vmem>>, vector<1x32xf32>
    %c3_20 = arith.constant 3 : index
    %c0_21 = arith.constant 0 : index
    %39 = vector.load %arg11[%c3_20, %c0_21] : memref<16x32xf32, #tpu.memory_space<vmem>>, vector<1x32xf32>
    tpu.vector_store %arg11[%c3_20, %c0_21], %38 {strides = array<i32>} : memref<16x32xf32, #tpu.memory_space<vmem>>, vector<1x32xf32>,
    %c4_i32 = arith.constant 4 : i32
    %40 = arith.addi %3, %c4_i32 : i32
    %41 = arith.index_cast %40 : i32 to index
    %42 = memref.load %arg1[%41] : memref<48xi32, #tpu.memory_space<smem>>
    %43 = arith.index_cast %42 : i32 to index
    %c0_22 = arith.constant 0 : index
    %44 = vector.load %arg8[%43, %c0_22] : memref<16x32xf32, #tpu.memory_space<vmem>>, vector<1x32xf32>
    %c4 = arith.constant 4 : index
    %c0_23 = arith.constant 0 : index
    %45 = vector.load %arg10[%c4, %c0_23] : memref<16x32xf32, #tpu.memory_space<vmem>>, vector<1x32xf32>
    tpu.vector_store %arg10[%c4, %c0_23], %44 {strides = array<i32>} : memref<16x32xf32, #tpu.memory_space<vmem>>, vector<1x32xf32>,
    %46 = arith.index_cast %42 : i32 to index
    %c0_24 = arith.constant 0 : index
    %47 = vector.load %arg9[%46, %c0_24] : memref<16x32xf32, #tpu.memory_space<vmem>>, vector<1x32xf32>
    %c4_25 = arith.constant 4 : index
    %c0_26 = arith.constant 0 : index
    %48 = vector.load %arg11[%c4_25, %c0_26] : memref<16x32xf32, #tpu.memory_space<vmem>>, vector<1x32xf32>
    tpu.vector_store %arg11[%c4_25, %c0_26], %47 {strides = array<i32>} : memref<16x32xf32, #tpu.memory_space<vmem>>, vector<1x32xf32>,
    %c5_i32 = arith.constant 5 : i32
    %49 = arith.addi %3, %c5_i32 : i32
    %50 = arith.index_cast %49 : i32 to index
    %51 = memref.load %arg1[%50] : memref<48xi32, #tpu.memory_space<smem>>
    %52 = arith.index_cast %51 : i32 to index
    %c0_27 = arith.constant 0 : index
    %53 = vector.load %arg8[%52, %c0_27] : memref<16x32xf32, #tpu.memory_space<vmem>>, vector<1x32xf32>
    %c5 = arith.constant 5 : index
    %c0_28 = arith.constant 0 : index
    %54 = vector.load %arg10[%c5, %c0_28] : memref<16x32xf32, #tpu.memory_space<vmem>>, vector<1x32xf32>
    tpu.vector_store %arg10[%c5, %c0_28], %53 {strides = array<i32>} : memref<16x32xf32, #tpu.memory_space<vmem>>, vector<1x32xf32>,
    %55 = arith.index_cast %51 : i32 to index
    %c0_29 = arith.constant 0 : index
    %56 = vector.load %arg9[%55, %c0_29] : memref<16x32xf32, #tpu.memory_space<vmem>>, vector<1x32xf32>
    %c5_30 = arith.constant 5 : index
    %c0_31 = arith.constant 0 : index
    %57 = vector.load %arg11[%c5_30, %c0_31] : memref<16x32xf32, #tpu.memory_space<vmem>>, vector<1x32xf32>
    tpu.vector_store %arg11[%c5_30, %c0_31], %56 {strides = array<i32>} : memref<16x32xf32, #tpu.memory_space<vmem>>, vector<1x32xf32>,
    %c6_i32 = arith.constant 6 : i32
    %58 = arith.addi %3, %c6_i32 : i32
    %59 = arith.index_cast %58 : i32 to index
    %60 = memref.load %arg1[%59] : memref<48xi32, #tpu.memory_space<smem>>
    %61 = arith.index_cast %60 : i32 to index
    %c0_32 = arith.constant 0 : index
    %62 = vector.load %arg8[%61, %c0_32] : memref<16x32xf32, #tpu.memory_space<vmem>>, vector<1x32xf32>
    %c6 = arith.constant 6 : index
    %c0_33 = arith.constant 0 : index
    %63 = vector.load %arg10[%c6, %c0_33] : memref<16x32xf32, #tpu.memory_space<vmem>>, vector<1x32xf32>
    tpu.vector_store %arg10[%c6, %c0_33], %62 {strides = array<i32>} : memref<16x32xf32, #tpu.memory_space<vmem>>, vector<1x32xf32>,
    %64 = arith.index_cast %60 : i32 to index
    %c0_34 = arith.constant 0 : index
    %65 = vector.load %arg9[%64, %c0_34] : memref<16x32xf32, #tpu.memory_space<vmem>>, vector<1x32xf32>
    %c6_35 = arith.constant 6 : index
    %c0_36 = arith.constant 0 : index
    %66 = vector.load %arg11[%c6_35, %c0_36] : memref<16x32xf32, #tpu.memory_space<vmem>>, vector<1x32xf32>
    tpu.vector_store %arg11[%c6_35, %c0_36], %65 {strides = array<i32>} : memref<16x32xf32, #tpu.memory_space<vmem>>, vector<1x32xf32>,
    %c7_i32 = arith.constant 7 : i32
    %67 = arith.addi %3, %c7_i32 : i32
    %68 = arith.index_cast %67 : i32 to index
    %69 = memref.load %arg1[%68] : memref<48xi32, #tpu.memory_space<smem>>
    %70 = arith.index_cast %69 : i32 to index
    %c0_37 = arith.constant 0 : index
    %71 = vector.load %arg8[%70, %c0_37] : memref<16x32xf32, #tpu.memory_space<vmem>>, vector<1x32xf32>
    %c7 = arith.constant 7 : index
    %c0_38 = arith.constant 0 : index
    %72 = vector.load %arg10[%c7, %c0_38] : memref<16x32xf32, #tpu.memory_space<vmem>>, vector<1x32xf32>
    tpu.vector_store %arg10[%c7, %c0_38], %71 {strides = array<i32>} : memref<16x32xf32, #tpu.memory_space<vmem>>, vector<1x32xf32>,
    %73 = arith.index_cast %69 : i32 to index
    %c0_39 = arith.constant 0 : index
    %74 = vector.load %arg9[%73, %c0_39] : memref<16x32xf32, #tpu.memory_space<vmem>>, vector<1x32xf32>
    %c7_40 = arith.constant 7 : index
    %c0_41 = arith.constant 0 : index
    %75 = vector.load %arg11[%c7_40, %c0_41] : memref<16x32xf32, #tpu.memory_space<vmem>>, vector<1x32xf32>
    tpu.vector_store %arg11[%c7_40, %c0_41], %74 {strides = array<i32>} : memref<16x32xf32, #tpu.memory_space<vmem>>, vector<1x32xf32>,
    %c8_i32 = arith.constant 8 : i32
    %76 = arith.addi %3, %c8_i32 : i32
    %77 = arith.index_cast %76 : i32 to index
    %78 = memref.load %arg1[%77] : memref<48xi32, #tpu.memory_space<smem>>
    %79 = arith.index_cast %78 : i32 to index
    %c0_42 = arith.constant 0 : index
    %80 = vector.load %arg8[%79, %c0_42] : memref<16x32xf32, #tpu.memory_space<vmem>>, vector<1x32xf32>
    %c8 = arith.constant 8 : index
    %c0_43 = arith.constant 0 : index
    %81 = vector.load %arg10[%c8, %c0_43] : memref<16x32xf32, #tpu.memory_space<vmem>>, vector<1x32xf32>
    tpu.vector_store %arg10[%c8, %c0_43], %80 {strides = array<i32>} : memref<16x32xf32, #tpu.memory_space<vmem>>, vector<1x32xf32>,
    %82 = arith.index_cast %78 : i32 to index
    %c0_44 = arith.constant 0 : index
    %83 = vector.load %arg9[%82, %c0_44] : memref<16x32xf32, #tpu.memory_space<vmem>>, vector<1x32xf32>
    %c8_45 = arith.constant 8 : index
    %c0_46 = arith.constant 0 : index
    %84 = vector.load %arg11[%c8_45, %c0_46] : memref<16x32xf32, #tpu.memory_space<vmem>>, vector<1x32xf32>
    tpu.vector_store %arg11[%c8_45, %c0_46], %83 {strides = array<i32>} : memref<16x32xf32, #tpu.memory_space<vmem>>, vector<1x32xf32>,
    %c9_i32 = arith.constant 9 : i32
    %85 = arith.addi %3, %c9_i32 : i32
    %86 = arith.index_cast %85 : i32 to index
    %87 = memref.load %arg1[%86] : memref<48xi32, #tpu.memory_space<smem>>
    %88 = arith.index_cast %87 : i32 to index
    %c0_47 = arith.constant 0 : index
    %89 = vector.load %arg8[%88, %c0_47] : memref<16x32xf32, #tpu.memory_space<vmem>>, vector<1x32xf32>
    %c9 = arith.constant 9 : index
    %c0_48 = arith.constant 0 : index
    %90 = vector.load %arg10[%c9, %c0_48] : memref<16x32xf32, #tpu.memory_space<vmem>>, vector<1x32xf32>
    tpu.vector_store %arg10[%c9, %c0_48], %89 {strides = array<i32>} : memref<16x32xf32, #tpu.memory_space<vmem>>, vector<1x32xf32>,
    %91 = arith.index_cast %87 : i32 to index
    %c0_49 = arith.constant 0 : index
    %92 = vector.load %arg9[%91, %c0_49] : memref<16x32xf32, #tpu.memory_space<vmem>>, vector<1x32xf32>
    %c9_50 = arith.constant 9 : index
    %c0_51 = arith.constant 0 : index
    %93 = vector.load %arg11[%c9_50, %c0_51] : memref<16x32xf32, #tpu.memory_space<vmem>>, vector<1x32xf32>
    tpu.vector_store %arg11[%c9_50, %c0_51], %92 {strides = array<i32>} : memref<16x32xf32, #tpu.memory_space<vmem>>, vector<1x32xf32>,
    %c10_i32 = arith.constant 10 : i32
    %94 = arith.addi %3, %c10_i32 : i32
    %95 = arith.index_cast %94 : i32 to index
    %96 = memref.load %arg1[%95] : memref<48xi32, #tpu.memory_space<smem>>
    %97 = arith.index_cast %96 : i32 to index
    %c0_52 = arith.constant 0 : index
    %98 = vector.load %arg8[%97, %c0_52] : memref<16x32xf32, #tpu.memory_space<vmem>>, vector<1x32xf32>
    %c10 = arith.constant 10 : index
    %c0_53 = arith.constant 0 : index
    %99 = vector.load %arg10[%c10, %c0_53] : memref<16x32xf32, #tpu.memory_space<vmem>>, vector<1x32xf32>
    tpu.vector_store %arg10[%c10, %c0_53], %98 {strides = array<i32>} : memref<16x32xf32, #tpu.memory_space<vmem>>, vector<1x32xf32>,
    %100 = arith.index_cast %96 : i32 to index
    %c0_54 = arith.constant 0 : index
    %101 = vector.load %arg9[%100, %c0_54] : memref<16x32xf32, #tpu.memory_space<vmem>>, vector<1x32xf32>
    %c10_55 = arith.constant 10 : index
    %c0_56 = arith.constant 0 : index
    %102 = vector.load %arg11[%c10_55, %c0_56] : memref<16x32xf32, #tpu.memory_space<vmem>>, vector<1x32xf32>
    tpu.vector_store %arg11[%c10_55, %c0_56], %101 {strides = array<i32>} : memref<16x32xf32, #tpu.memory_space<vmem>>, vector<1x32xf32>,
    %c11_i32 = arith.constant 11 : i32
    %103 = arith.addi %3, %c11_i32 : i32
    %104 = arith.index_cast %103 : i32 to index
    %105 = memref.load %arg1[%104] : memref<48xi32, #tpu.memory_space<smem>>
    %106 = arith.index_cast %105 : i32 to index
    %c0_57 = arith.constant 0 : index
    %107 = vector.load %arg8[%106, %c0_57] : memref<16x32xf32, #tpu.memory_space<vmem>>, vector<1x32xf32>
    %c11 = arith.constant 11 : index
    %c0_58 = arith.constant 0 : index
    %108 = vector.load %arg10[%c11, %c0_58] : memref<16x32xf32, #tpu.memory_space<vmem>>, vector<1x32xf32>
    tpu.vector_store %arg10[%c11, %c0_58], %107 {strides = array<i32>} : memref<16x32xf32, #tpu.memory_space<vmem>>, vector<1x32xf32>,
    %109 = arith.index_cast %105 : i32 to index
    %c0_59 = arith.constant 0 : index
    %110 = vector.load %arg9[%109, %c0_59] : memref<16x32xf32, #tpu.memory_space<vmem>>, vector<1x32xf32>
    %c11_60 = arith.constant 11 : index
    %c0_61 = arith.constant 0 : index
    %111 = vector.load %arg11[%c11_60, %c0_61] : memref<16x32xf32, #tpu.memory_space<vmem>>, vector<1x32xf32>
    tpu.vector_store %arg11[%c11_60, %c0_61], %110 {strides = array<i32>} : memref<16x32xf32, #tpu.memory_space<vmem>>, vector<1x32xf32>,
    %c12_i32 = arith.constant 12 : i32
    %112 = arith.addi %3, %c12_i32 : i32
    %113 = arith.index_cast %112 : i32 to index
    %114 = memref.load %arg1[%113] : memref<48xi32, #tpu.memory_space<smem>>
    %115 = arith.index_cast %114 : i32 to index
    %c0_62 = arith.constant 0 : index
    %116 = vector.load %arg8[%115, %c0_62] : memref<16x32xf32, #tpu.memory_space<vmem>>, vector<1x32xf32>
    %c12 = arith.constant 12 : index
    %c0_63 = arith.constant 0 : index
    %117 = vector.load %arg10[%c12, %c0_63] : memref<16x32xf32, #tpu.memory_space<vmem>>, vector<1x32xf32>
    tpu.vector_store %arg10[%c12, %c0_63], %116 {strides = array<i32>} : memref<16x32xf32, #tpu.memory_space<vmem>>, vector<1x32xf32>,
    %118 = arith.index_cast %114 : i32 to index
    %c0_64 = arith.constant 0 : index
    %119 = vector.load %arg9[%118, %c0_64] : memref<16x32xf32, #tpu.memory_space<vmem>>, vector<1x32xf32>
    %c12_65 = arith.constant 12 : index
    %c0_66 = arith.constant 0 : index
    %120 = vector.load %arg11[%c12_65, %c0_66] : memref<16x32xf32, #tpu.memory_space<vmem>>, vector<1x32xf32>
    tpu.vector_store %arg11[%c12_65, %c0_66], %119 {strides = array<i32>} : memref<16x32xf32, #tpu.memory_space<vmem>>, vector<1x32xf32>,
    %c13_i32 = arith.constant 13 : i32
    %121 = arith.addi %3, %c13_i32 : i32
    %122 = arith.index_cast %121 : i32 to index
    %123 = memref.load %arg1[%122] : memref<48xi32, #tpu.memory_space<smem>>
    %124 = arith.index_cast %123 : i32 to index
    %c0_67 = arith.constant 0 : index
    %125 = vector.load %arg8[%124, %c0_67] : memref<16x32xf32, #tpu.memory_space<vmem>>, vector<1x32xf32>
    %c13 = arith.constant 13 : index
    %c0_68 = arith.constant 0 : index
    %126 = vector.load %arg10[%c13, %c0_68] : memref<16x32xf32, #tpu.memory_space<vmem>>, vector<1x32xf32>
    tpu.vector_store %arg10[%c13, %c0_68], %125 {strides = array<i32>} : memref<16x32xf32, #tpu.memory_space<vmem>>, vector<1x32xf32>,
    %127 = arith.index_cast %123 : i32 to index
    %c0_69 = arith.constant 0 : index
    %128 = vector.load %arg9[%127, %c0_69] : memref<16x32xf32, #tpu.memory_space<vmem>>, vector<1x32xf32>
    %c13_70 = arith.constant 13 : index
    %c0_71 = arith.constant 0 : index
    %129 = vector.load %arg11[%c13_70, %c0_71] : memref<16x32xf32, #tpu.memory_space<vmem>>, vector<1x32xf32>
    tpu.vector_store %arg11[%c13_70, %c0_71], %128 {strides = array<i32>} : memref<16x32xf32, #tpu.memory_space<vmem>>, vector<1x32xf32>,
    %c14_i32 = arith.constant 14 : i32
    %130 = arith.addi %3, %c14_i32 : i32
    %131 = arith.index_cast %130 : i32 to index
    %132 = memref.load %arg1[%131] : memref<48xi32, #tpu.memory_space<smem>>
    %133 = arith.index_cast %132 : i32 to index
    %c0_72 = arith.constant 0 : index
    %134 = vector.load %arg8[%133, %c0_72] : memref<16x32xf32, #tpu.memory_space<vmem>>, vector<1x32xf32>
    %c14 = arith.constant 14 : index
    %c0_73 = arith.constant 0 : index
    %135 = vector.load %arg10[%c14, %c0_73] : memref<16x32xf32, #tpu.memory_space<vmem>>, vector<1x32xf32>
    tpu.vector_store %arg10[%c14, %c0_73], %134 {strides = array<i32>} : memref<16x32xf32, #tpu.memory_space<vmem>>, vector<1x32xf32>,
    %136 = arith.index_cast %132 : i32 to index
    %c0_74 = arith.constant 0 : index
    %137 = vector.load %arg9[%136, %c0_74] : memref<16x32xf32, #tpu.memory_space<vmem>>, vector<1x32xf32>
    %c14_75 = arith.constant 14 : index
    %c0_76 = arith.constant 0 : index
    %138 = vector.load %arg11[%c14_75, %c0_76] : memref<16x32xf32, #tpu.memory_space<vmem>>, vector<1x32xf32>
    tpu.vector_store %arg11[%c14_75, %c0_76], %137 {strides = array<i32>} : memref<16x32xf32, #tpu.memory_space<vmem>>, vector<1x32xf32>,
    %c15_i32 = arith.constant 15 : i32
    %139 = arith.addi %3, %c15_i32 : i32
    %140 = arith.index_cast %139 : i32 to index
    %141 = memref.load %arg1[%140] : memref<48xi32, #tpu.memory_space<smem>>
    %142 = arith.index_cast %141 : i32 to index
    %c0_77 = arith.constant 0 : index
    %143 = vector.load %arg8[%142, %c0_77] : memref<16x32xf32, #tpu.memory_space<vmem>>, vector<1x32xf32>
    %c15 = arith.constant 15 : index
    %c0_78 = arith.constant 0 : index
    %144 = vector.load %arg10[%c15, %c0_78] : memref<16x32xf32, #tpu.memory_space<vmem>>, vector<1x32xf32>
    tpu.vector_store %arg10[%c15, %c0_78], %143 {strides = array<i32>} : memref<16x32xf32, #tpu.memory_space<vmem>>, vector<1x32xf32>,
    %145 = arith.index_cast %141 : i32 to index
    %c0_79 = arith.constant 0 : index
    %146 = vector.load %arg9[%145, %c0_79] : memref<16x32xf32, #tpu.memory_space<vmem>>, vector<1x32xf32>
    %c15_80 = arith.constant 15 : index
    %c0_81 = arith.constant 0 : index
    %147 = vector.load %arg11[%c15_80, %c0_81] : memref<16x32xf32, #tpu.memory_space<vmem>>, vector<1x32xf32>
    tpu.vector_store %arg11[%c15_80, %c0_81], %146 {strides = array<i32>} : memref<16x32xf32, #tpu.memory_space<vmem>>, vector<1x32xf32>,
    %c0_82 = arith.constant 0 : index
    %c0_83 = arith.constant 0 : index
    %148 = vector.load %arg10[%c0_82, %c0_83] : memref<16x32xf32, #tpu.memory_space<vmem>>, vector<16x32xf32>
    %149 = arith.truncf %148 : vector<16x32xf32> to vector<16x32xbf16>
    %c0_84 = arith.constant 0 : index
    %c0_85 = arith.constant 0 : index
    %150 = vector.load %arg3[%c0_84, %c0_85] : memref<32x128xbf16, #tpu.memory_space<vmem>>, vector<32x128xbf16>
    %cst = arith.constant dense<0.000000e+00> : vector<16x128xf32>
    %151 = tpu.matmul %149, %150, %cst {dimension_numbers = #tpu.dot_dimension_numbers<[1], [0], [0], [1], [0, 0, 1, 1], [], []>} : vector<16x32xbf16>, vector<32x128xbf16>, vector<16x128xf32> -> vector<16x128xf32>
    %c0_86 = arith.constant 0 : index
    %c0_87 = arith.constant 0 : index
    %c0_88 = arith.constant 0 : index
    %152 = vector.load %arg2[%c0_86, %c0_87, %c0_88] : memref<1x8x128xf32, #tpu.memory_space<vmem>>, vector<1x8x128xf32>
    %153 = vector.shape_cast %152 : vector<1x8x128xf32> to vector<8x128xf32>
    %154 = vector.extract_strided_slice %151 {offsets = [0, 0], sizes = [8, 128], strides = [1, 1]} : vector<16x128xf32> to vector<8x128xf32>
    %155 = vector.extract_strided_slice %151 {offsets = [8, 0], sizes = [8, 128], strides = [1, 1]} : vector<16x128xf32> to vector<8x128xf32>
    %156 = arith.addf %154, %155 : vector<8x128xf32>
    %157 = arith.addf %153, %156 : vector<8x128xf32>
    %158 = vector.extract_strided_slice %157 {offsets = [0, 0], sizes = [8, 32], strides = [1, 1]} : vector<8x128xf32> to vector<8x32xf32>
    %159 = arith.negf %158 : vector<8x32xf32>
    %160 = math.exp %159 : vector<8x32xf32>
    %cst_89 = arith.constant 1.000000e+00 : f32
    %161 = vector.broadcast %cst_89 : f32 to vector<8x32xf32>
    %162 = arith.addf %161, %160 : vector<8x32xf32>
    %163 = arith.divf %161, %162 : vector<8x32xf32>
    %164 = vector.extract_strided_slice %157 {offsets = [0, 32], sizes = [8, 32], strides = [1, 1]} : vector<8x128xf32> to vector<8x32xf32>
    %165 = arith.negf %164 : vector<8x32xf32>
    %166 = math.exp %165 : vector<8x32xf32>
    %cst_90 = arith.constant 1.000000e+00 : f32
    %167 = vector.broadcast %cst_90 : f32 to vector<8x32xf32>
    %168 = arith.addf %167, %166 : vector<8x32xf32>
    %169 = arith.divf %167, %168 : vector<8x32xf32>
    %170 = vector.extract_strided_slice %157 {offsets = [0, 64], sizes = [8, 32], strides = [1, 1]} : vector<8x128xf32> to vector<8x32xf32>
    %171 = math.tanh %170 : vector<8x32xf32>
    %172 = vector.extract_strided_slice %153 {offsets = [0, 96], sizes = [8, 32], strides = [1, 1]} : vector<8x128xf32> to vector<8x32xf32>
    %173 = arith.mulf %163, %171 : vector<8x32xf32>
    %174 = vector.extract_strided_slice %154 {offsets = [0, 96], sizes = [8, 32], strides = [1, 1]} : vector<8x128xf32> to vector<8x32xf32>
    %175 = arith.addf %172, %174 : vector<8x32xf32>
    %176 = arith.negf %175 : vector<8x32xf32>
    %177 = math.exp %176 : vector<8x32xf32>
    %cst_91 = arith.constant 1.000000e+00 : f32
    %178 = vector.broadcast %cst_91 : f32 to vector<8x32xf32>
    %179 = arith.addf %178, %177 : vector<8x32xf32>
    %180 = arith.divf %178, %179 : vector<8x32xf32>
    %c0_92 = arith.constant 0 : index
    %c0_93 = arith.constant 0 : index
    %181 = vector.load %arg11[%c0_92, %c0_93] : memref<16x32xf32, #tpu.memory_space<vmem>>, vector<8x32xf32>
    %182 = arith.mulf %180, %181 : vector<8x32xf32>
    %183 = arith.addf %173, %182 : vector<8x32xf32>
    %184 = vector.extract_strided_slice %155 {offsets = [0, 96], sizes = [8, 32], strides = [1, 1]} : vector<8x128xf32> to vector<8x32xf32>
    %185 = arith.addf %172, %184 : vector<8x32xf32>
    %186 = arith.negf %185 : vector<8x32xf32>
    %187 = math.exp %186 : vector<8x32xf32>
    %cst_94 = arith.constant 1.000000e+00 : f32
    %188 = vector.broadcast %cst_94 : f32 to vector<8x32xf32>
    %189 = arith.addf %188, %187 : vector<8x32xf32>
    %190 = arith.divf %188, %189 : vector<8x32xf32>
    %c8_95 = arith.constant 8 : index
    %c0_96 = arith.constant 0 : index
    %191 = vector.load %arg11[%c8_95, %c0_96] : memref<16x32xf32, #tpu.memory_space<vmem>>, vector<8x32xf32>
    %192 = arith.mulf %190, %191 : vector<8x32xf32>
    %193 = arith.addf %183, %192 : vector<8x32xf32>
    %194 = math.tanh %193 : vector<8x32xf32>
    %195 = arith.mulf %169, %194 : vector<8x32xf32>
    %c0_97 = arith.constant 0 : index
    %c0_98 = arith.constant 0 : index
    %196 = vector.load %arg8[%c0_97, %c0_98] : memref<16x32xf32, #tpu.memory_space<vmem>>, vector<8x32xf32>
    tpu.vector_store %arg8[%c0_97, %c0_98], %195 {strides = array<i32>} : memref<16x32xf32, #tpu.memory_space<vmem>>, vector<8x32xf32>,
    %c0_99 = arith.constant 0 : index
    %c0_100 = arith.constant 0 : index
    %197 = vector.load %arg9[%c0_99, %c0_100] : memref<16x32xf32, #tpu.memory_space<vmem>>, vector<8x32xf32>
    tpu.vector_store %arg9[%c0_99, %c0_100], %193 {strides = array<i32>} : memref<16x32xf32, #tpu.memory_space<vmem>>, vector<8x32xf32>,
    %c2_i32_101 = arith.constant 2 : i32
    %198 = arith.cmpi eq, %arg0, %c2_i32_101 : i32
    %199 = arith.extui %198 : i1 to i32
    %c0_i32_102 = arith.constant 0 : i32
    %200 = arith.cmpi ne, %199, %c0_i32_102 : i32
    scf.if %200 {
      %c0_103 = arith.constant 0 : index
      %c0_104 = arith.constant 0 : index
      %201 = vector.load %arg6[%c0_103, %c0_104] : memref<8x32xf32, #tpu.memory_space<vmem>>, vector<8x32xf32>
      tpu.vector_store %arg6[%c0_103, %c0_104], %195 {strides = array<i32>} : memref<8x32xf32, #tpu.memory_space<vmem>>, vector<8x32xf32>,
      %c0_105 = arith.constant 0 : index
      %c0_106 = arith.constant 0 : index
      %202 = vector.load %arg7[%c0_105, %c0_106] : memref<8x32xf32, #tpu.memory_space<vmem>>, vector<8x32xf32>
      tpu.vector_store %arg7[%c0_105, %c0_106], %193 {strides = array<i32>} : memref<8x32xf32, #tpu.memory_space<vmem>>, vector<8x32xf32>,
    } else {
    }
    return
  }
  func.func @transform_0(%arg0: i32, %arg1: memref<48xi32, #tpu.memory_space<smem>>) -> (i32, i32, i32) {
    %c0_i32 = arith.constant 0 : i32
    %c0_i32_0 = arith.constant 0 : i32
    %c0_i32_1 = arith.constant 0 : i32
    return %arg0, %c0_i32, %c0_i32_0 : i32, i32, i32
  }
  func.func @transform_1(%arg0: i32, %arg1: memref<48xi32, #tpu.memory_space<smem>>) -> (i32, i32) {
    %c0_i32 = arith.constant 0 : i32
    %c0_i32_0 = arith.constant 0 : i32
    %c0_i32_1 = arith.constant 0 : i32
    return %c0_i32, %c0_i32_0 : i32, i32
  }
  func.func @transform_2(%arg0: i32, %arg1: memref<48xi32, #tpu.memory_space<smem>>) -> (i32, i32) {
    %c0_i32 = arith.constant 0 : i32
    %c0_i32_0 = arith.constant 0 : i32
    %c0_i32_1 = arith.constant 0 : i32
    return %c0_i32, %c0_i32_0 : i32, i32
  }
  func.func @transform_3(%arg0: i32, %arg1: memref<48xi32, #tpu.memory_space<smem>>) -> (i32, i32) {
    %c0_i32 = arith.constant 0 : i32
    %c0_i32_0 = arith.constant 0 : i32
    %c0_i32_1 = arith.constant 0 : i32
    return %c0_i32, %c0_i32_0 : i32, i32
  }
  func.func @transform_4(%arg0: i32, %arg1: memref<48xi32, #tpu.memory_space<smem>>) -> (i32, i32) {
    %c0_i32 = arith.constant 0 : i32
    %c0_i32_0 = arith.constant 0 : i32
    %c0_i32_1 = arith.constant 0 : i32
    return %c0_i32, %c0_i32_0 : i32, i32
  }
  func.func @transform_5(%arg0: i32, %arg1: memref<48xi32, #tpu.memory_space<smem>>) -> (i32, i32) {
    %c0_i32 = arith.constant 0 : i32
    %c0_i32_0 = arith.constant 0 : i32
    %c0_i32_1 = arith.constant 0 : i32
    return %c0_i32, %c0_i32_0 : i32, i32
  }
}

</mosaic_0001>

<bundles_post_ra>
// kernel: tpu_custom_call.1
= control target key start
LH: loop header
LB: loop body
LE: loop exit
PB: predicated region body
PF: predicated region fallthrough
CT: control target
= control target key end

     0   :  { %s1407_s0 = inlined_call_operand.hbm [shape: s32[48], index: 0, kind: input, shape index: {}]   ;;  %s1408_s1 = inlined_call_operand.hbm [shape: f32[3,8,128], index: 1, kind: input, shape index: {}]   ;;  %s1409_s2 = inlined_call_operand.hbm [shape: bf16[32,128], index: 2, kind: input, shape index: {}]   ;;  %s1410_s3 = inlined_call_operand.vmem [shape: f32[8,32], index: 3, kind: input, shape index: {}]   ;;  %s1411_s4 = inlined_call_operand.hbm [shape: f32[8,32], index: 4, kind: input, shape index: {}]   ;;  %s1412_s5 = inlined_call_operand.hbm [shape: f32[8,32], index: 5, kind: output, shape index: {0}]   ;;  %s1413_s6 = inlined_call_operand.hbm [shape: f32[8,32], index: 6, kind: output, shape index: {1}]  }
   0x1   :  { %1417 = sst [smem:[#allocation22_spill]] %s1408_s1  ;;  %s801_s23 = scalar_lea.hbm %s1407_s0, 16 }
   0x2   :  { %1418 = sst [smem:[#allocation23_spill]] %s1409_s2  ;;  %p802_p0 = scmp.ne.s32.totalorder %s1407_s0, %s801_s23 }
   0x3   :  { %1419 = sst [smem:[#allocation24_spill]] %s1410_s3  ;;  %p805_p1 = scmp.lt.u32.totalorder %s801_s23, %s1407_s0 }
   0x4   :  { %1420 = sst [smem:[#allocation25_spill]] %s1411_s4 }
   0x5   :  { %p807_p2 = pnand %p805_p1, %p802_p0 }
   0x7   :  { %810 = shalt.err (!%p807_p2)  }
   0x8   :  { %s999_s28 = smov [#allocation7]  }
   0x9   :  { %13 = dma.hbm_to_smem %s1407_s0, 16, %s999_s28, [#allocation6] }
   0xa   :  { %965 = dma.done.wait [#allocation6], 16 }
   0xb   :  { %966 = vsyncadd [#allocation6], 4294967280 }
   0xc   :  { %15 = sfence }
   0xd   :  { %16 = vsyncpa [#allocation9], 0 }
   0xe   :  { %18 = vsyncpa [#allocation9 + $0x1], 0 }
   0xf   :  { %19 = vsyncpa [#allocation12], 0 }
  0x10   :  { %20 = vsyncpa [#allocation10], 0 }
  0x11   :  { %21 = vsyncpa [#allocation16], 0  ;;  %s1060_s7 = smov 0   ;;  %s1062_s8 = smov 0  }
  0x12   :  { %s1064_s9 = smov 0   ;;  %s1066_s10 = smov 0  }
  0x13 LB: > { %s1079_s0 = sadd.s32 4294967295, %s997_s10   ;;  %p47_p3 = scmp.ne.s32.totalorder %s989_s8, %s985_s7  ;;  %s997_s10 = sphi %s1066_s10, %s1438_s10   ;;  %s993_s9 = sphi %s1064_s9, %s1437_s9   ;;  %s989_s8 = sphi %s1062_s8, %s1436_s8   ;;  %s985_s7 = sphi %s1060_s7, %s1435_s7  }
  0x14   : > { %p1414_p4 = scmp.eq.s32.totalorder %s1079_s0, 0  ;;  %p664_p5 = scmp.ge.s32.totalorder %s997_s10, 1 }
  0x15   : > { %p163_p6 = scmp.lt.s32.totalorder %s997_s10, 4  ;;  %s1000_s13 = smov [#allocation11]  }
  0x16   : > { %p1088_p8 = por %p1414_p4, %p47_p3  ;;  %s175_s14 = sshll.u32 %s1000_s13, 4  ;;  %s176_s14 = int_to_ptr.vmem [resolvable:$true] %s175_s14 }
  0x17   : > { %p1092_p9 = pnand %p664_p5, %p163_p6  ;;  %s1001_s16 = smov [#allocation13]  }
  0x18   : > { %s1421_s11 = scalar_select %p1088_p8, 1, 0 }
  0x19   : > { %s1422_s12 = scalar_select %p1092_p9, 1, 0 }
  0x1a   : > { %p718_p10 = pneg %p1092_p9  ;;  %s192_s17 = sshll.u32 %s1001_s16, 4  ;;  %s1104_s17 = int_to_ptr.vmem [resolvable:$true] %s192_s17 }
  0x1b   : > { %s1424_s2 = sld [smem:[#allocation23_spill]] }
  0x1c   : > { %p1100_p11 = pnand %p718_p10, %p1414_p4 }
  0x1e   : > { %p813_p13 = pneg %p1100_p11 }
  0x21   : > { %s811_s20 = scalar_lea.hbm %s1424_s2, 256 }
  0x22   : > { %p812_p12 = scmp.ne.s32.totalorder %s1424_s2, %s811_s20  ;;  %p818_p2 = scmp.lt.u32.totalorder %s811_s20, %s1424_s2 }
  0x24   : > { %p814_p0 = pnand %p813_p13, %p812_p12 }
  0x26   : > { %p815_p1 = pneg %p814_p0 }
  0x28   : > { %p820_p3 = pnand %p818_p2, %p815_p1 }
  0x2a   : > { %823 = shalt.err (!%p820_p3)
}
  0x2b   : > { %s824_s25 = scalar_lea.vmem %s176_s14, 256  ;;  %p832_p7 = scmp.lt.s32.totalorder %s176_s14, %s176_s14 }
  0x2c   : > { %p825_p5 = scmp.ne.s32.totalorder %s176_s14, %s824_s25  ;;  %p833_p4 = scmp.lt.s32.totalorder %s824_s25, %s824_s25 }
  0x2e   : > { %p827_p6 = pnand %p825_p5, %p813_p13  ;;  %p834_p8 = por %p833_p4, %p832_p7 }
  0x30   : > { %p828_p10 = pneg %p827_p6 }
  0x32   : > { %p835_p9 = pnand %p834_p8, %p828_p10 }
  0x34   : > { %838 = shalt.err (!%p835_p9)
}
  0x35   : > { %s1002_s26 = smov 64   ;;  %s1003_s27 = smov 4  }
  0x36   : > { %721 = dma.hbm_to_vmem [thread:$0]  (!%p1100_p11), %s1424_s2, 256, %s176_s14, [#allocation12], %s1002_s26, %s1002_s26, %s1003_s27  }
  0x37   : > { %s1425_s4 = sld [smem:[#allocation25_spill]] }
  0x3d   : > { %s839_s13 = scalar_lea.hbm %s1425_s4, 128 }
  0x3e   : > { %p840_p12 = scmp.ne.s32.totalorder %s1425_s4, %s839_s13  ;;  %p846_p8 = scmp.lt.u32.totalorder %s839_s13, %s1425_s4 }
  0x40   : > { %p842_p4 = pnand %p840_p12, %p813_p13 }
  0x42   : > { %p843_p7 = pneg %p842_p4 }
  0x44   : > { %p848_p9 = pnand %p846_p8, %p843_p7 }
  0x46   : > { %851 = shalt.err (!%p848_p9)
}
  0x47   : > { %s852_s14 = scalar_lea.vmem %s1104_s17, 128  ;;  %p860_p3 = scmp.lt.s32.totalorder %s1104_s17, %s1104_s17 }
  0x48   : > { %p853_p0 = scmp.ne.s32.totalorder %s1104_s17, %s852_s14  ;;  %p861_p5 = scmp.lt.s32.totalorder %s852_s14, %s852_s14 }
  0x4a   : > { %p855_p1 = pnand %p853_p0, %p813_p13  ;;  %p862_p6 = por %p861_p5, %p860_p3 }
  0x4c   : > { %p856_p2 = pneg %p855_p1 }
  0x4e   : > { %p863_p10 = pnand %p862_p6, %p856_p2 }
  0x50   : > { %866 = shalt.err (!%p863_p10)
}
  0x51   : > { %724 = dma.hbm_to_vmem [thread:$0]  (!%p1100_p11), %s1425_s4, 128, %s1104_s17, [#allocation12]  }
  0x52   : > { %s1154_s23 = sadd.s32 1, %s997_s10   ;;  %s34_s24 = sadd.s32 1, %s993_s9 }
  0x53   : > { %s31_s15 = ssub.s32 %s997_s10, %s1154_s23  ;;  %p41_p13 = scmp.ne.s32.totalorder %s993_s9, %s989_s8 }
  0x54   : > { %p32_p12 = scmp.eq.s32.totalorder %s31_s15, 0  ;;  %p42_p4 = scmp.eq.s32.totalorder %s997_s10, 0 }
  0x55   : > { %p731_p7 = scmp.lt.s32.totalorder %s997_s10, 3  ;;  %s203_s25 = sand.u32 1, %s993_s9  }
  0x56   : > { %s1165_s26 = scalar_select %p32_p12, %s993_s9, %s34_s24  }
  0x57   : > { %p43_p8 = por %p42_p4, %p41_p13  ;;  %s668_s27 = sshll.u32 %s203_s25, 3 }
  0x58   : > { %s669_s28 = sshll.u32 %s997_s10, 7  ;;  %s1426_s1 = sld [smem:[#allocation22_spill]] }
  0x59   : > { %s207_s17 = scalar_lea.vmem [#allocation8], %s668_s27  ;;  %p1173_p11 = pnand %p731_p7, %p43_p8 }
  0x5a   : > { %s214_s13 = sshll.u32 %s207_s17, 4  ;;  %s204_s10 = scalar_lea.sflag [#allocation9], %s203_s25  ;;  %s1177_s13 = int_to_ptr.vmem [resolvable:$true] %s214_s13 }
  0x5b   : > { %p869_p0 = pneg %p1173_p11 }
  0x5e   : > { %s1171_s7 = scalar_lea.hbm %s1426_s1, %s669_s28  ;;  %s872_s14 = scalar_lea.hbm %s1426_s1, 384 }
  0x5f   : > { %s867_s18 = scalar_lea.hbm %s1171_s7, 128  ;;  %p873_p3 = scmp.lt.u32.totalorder %s1171_s7, %s1426_s1 }
  0x60   : > { %p868_p9 = scmp.ne.s32.totalorder %s1171_s7, %s867_s18  ;;  %p874_p5 = scmp.lt.u32.totalorder %s872_s14, %s867_s18 }
  0x61   : > { %p876_p10 = scmp.lt.u32.totalorder %s867_s18, %s1171_s7 }
  0x62   : > { %p870_p1 = pnand %p869_p0, %p868_p9  ;;  %p875_p6 = por %p874_p5, %p873_p3 }
  0x64   : > { %p871_p2 = pneg %p870_p1  ;;  %p877_p13 = por %p876_p10, %p875_p6 }
  0x66   : > { %p878_p12 = pnand %p877_p13, %p871_p2 }
  0x68   : > { %881 = shalt.err (!%p878_p12)
}
  0x69   : > { %s882_s24 = scalar_lea.vmem %s1177_s13, 128  ;;  %s1004_s15 = smov [#allocation8]  }
  0x6a   : > { %p883_p4 = scmp.ne.s32.totalorder %s1177_s13, %s882_s24  ;;  %s887_s25 = sshll.u32 %s1004_s15, 4  ;;  %s888_s25 = int_to_ptr.vmem [resolvable:$false] %s887_s25 }
  0x6b   : > { %s889_s27 = scalar_lea.vmem %s888_s25, 256  ;;  %p890_p9 = scmp.lt.s32.totalorder %s1177_s13, %s888_s25 }
  0x6c   : > { %p885_p7 = pnand %p883_p4, %p869_p0  ;;  %p891_p1 = scmp.lt.s32.totalorder %s889_s27, %s882_s24 }
  0x6e   : > { %p886_p8 = pneg %p885_p7  ;;  %p892_p3 = por %p891_p1, %p890_p9 }
  0x70   : > { %p893_p5 = pnand %p892_p3, %p886_p8 }
  0x72   : > { %896 = shalt.err (!%p893_p5)
}
  0x73   : > { %728 = dma.hbm_to_vmem [thread:$0]  (!%p1173_p11), %s1171_s7, 128, %s1177_s13, %s204_s10  }
  0x74   : > { %p1428_p2 = scmp.ne.s32.totalorder %s1422_s12, 0 }
  0x75   : > { %s225_s28 = sand.u32 (!%p1428_p2), 1, %s989_s8   ;;  %p1429_p0 = scmp.ne.s32.totalorder (!%p1428_p2), %s1421_s11, 0 }
  0x76   : > { %223 = sbr.rel (%p1428_p2) target bundleno = 835 (0x343), region = 36  ;;  %s1207_s29 = sshll.u32 (!%p1428_p2), %s225_s28, 3 }
  0x77   : > { %s226_s30 = scalar_lea.sflag (!%p1428_p2), [#allocation9], %s225_s28 }
  0x7d   : > { %968 = dma.done.wait (%p1429_p0), %s226_s30, 128  }
  0x7e   : > { %970 = vsyncadd (%p1429_p0), %s226_s30, 4294967168  ;;  %p1430_p6 = scmp.eq.s32.totalorder %s1079_s0, 0 }
  0x80   : > { %972 = dma.done.wait (%p1430_p6), [#allocation12], 384   ;;  %p1431_p11 = pmov %p1430_p6 }
  0x81   : > { %p1432_p10 = scmp.ne.s32.totalorder %s1079_s0, 0 }
  0x82   : > { %974 = vsyncadd (%p1431_p11), [#allocation12], 4294966912  ;;  %vm264_vm0 = vcmask (!%p1432_p10), 261120   ;;  %s1433_s3 = sld [smem:[#allocation24_spill]] (!%p1432_p10)  ;;  %v269_v1 = vld [vmem:[#allocation13] sm:$0xff] (!%p1432_p10)  ;;  %v1005_v2 = vmov (!%p1432_p10), 0.0  }
  0x83   : > { %263 = sbr.rel (%p1432_p10) target bundleno = 138 (0x8a), region = 52  ;;  %265 = vst.msk [vmem:[#allocation2] sm:$0xff] (!%p1432_p10), %vm264_vm0, %v1005_v2  ;;  %266 = vst.msk [vmem:[#allocation3] sm:$0xff] (!%p1432_p10), %vm264_vm0, %v1005_v2 }
  0x84   : > { %270 = vst.msk [vmem:[#allocation3 + $0x8] sm:$0xff] (!%p1432_p10), %vm264_vm0, %v269_v1 }
  0x88   : > { %v267_v0 = vld [vmem:[%s1433_s3] sm:$0xff] (!%p1432_p10) }
  0x89   : > { %268 = vst.msk [vmem:[#allocation2 + $0x8] sm:$0xff] (!%p1432_p10), %vm264_vm0, %v267_v0 }
  0x8a PF: > { %v783_v3 = vld [vmem:[#allocation11] sm:$0xff]   ;;  %v1006_v4 = vmov 0.0   ;;  %v784_v5 = vld [vmem:[#allocation11 + $0x8] sm:$0xff]   ;;  %vm1007_vm1 = vmmov 0   ;;  %s1224_s11 = sshll.u32 %s1079_s0, 4  ;;  %vm275_vm2 = vcmask 253952  }
  0x8b   : > { %692 = vmatprep.subr.bf16.mxu0 %v1006_v4  ;;  %696 = vmatprep.mubr.msk.bf16.mxu0 %vm1007_vm1, %v1006_v4  ;;  %s1227_s13 = sld [smem:[#allocation7 + %s1224_s11]]  ;;  %s280_s16 = sadd.s32 1, %s1224_s11  ;;  %vm419_vm3 = vcmask 261120  }
  0x8c   : > { %693 = vmatpush3.bf16.msra.mxu0 %v783_v3  ;;  %s1230_s10 = sld [smem:[#allocation7 + %s280_s16]]  ;;  %s288_s18 = sadd.s32 2, %s1224_s11 }
  0x8d   : > { %694 = vmatprep.subr.bf16.mxu0 %v1006_v4  ;;  %s1233_s19 = sld [smem:[#allocation7 + %s288_s18]]  ;;  %s296_s20 = sadd.s32 3, %s1224_s11 }
  0x8e   : > { %s1236_s14 = sld [smem:[#allocation7 + %s296_s20]]  ;;  %s304_s21 = sadd.s32 4, %s1224_s11 }
  0x8f   : > { %s1239_s22 = sld [smem:[#allocation7 + %s304_s21]]  ;;  %s312_s24 = sadd.s32 5, %s1224_s11 }
  0x90   : > { %695 = vmatpush3.bf16.msra.mxu0 %v784_v5  ;;  %s1242_s15 = sld [smem:[#allocation7 + %s312_s24]]  ;;  %s320_s25 = sadd.s32 6, %s1224_s11 }
  0x91   : > { %s1245_s27 = sld [smem:[#allocation7 + %s320_s25]]  ;;  %s273_s28 = scalar_lea.vmem [#allocation2], %s1227_s13 }
  0x92   : > { %v274_v6 = vld [vmem:[%s273_s28] sm:$0x1]  ;;  %s328_s30 = sadd.s32 7, %s1224_s11  ;;  %s282_s12 = scalar_lea.vmem [#allocation2], %s1230_s10 }
  0x93   : > { %276 = vst.msk [vmem:[#allocation4] sm:$0x1] %vm275_vm2, %v274_v6  ;;  %v283_v7 = vld [vmem:[%s282_s12] sm:$0x1]  ;;  %s1251_s7 = sld [smem:[#allocation7 + %s328_s30]]  ;;  %s290_s16 = scalar_lea.vmem [#allocation2], %s1233_s19 }
  0x94   : > { %284 = vst.msk [vmem:[#allocation4 + $0x1] sm:$0x1] %vm275_vm2, %v283_v7  ;;  %v291_v8 = vld [vmem:[%s290_s16] sm:$0x1]  ;;  %s336_s18 = sadd.s32 8, %s1224_s11  ;;  %s298_s20 = scalar_lea.vmem [#allocation2], %s1236_s14 }
  0x95   : > { %292 = vst.msk [vmem:[#allocation4 + $0x2] sm:$0x1] %vm275_vm2, %v291_v8  ;;  %v299_v9 = vld [vmem:[%s298_s20] sm:$0x1]  ;;  %s1258_s21 = sld [smem:[#allocation7 + %s336_s18]]  ;;  %s306_s24 = scalar_lea.vmem [#allocation2], %s1239_s22 }
  0x96   : > { %300 = vst.msk [vmem:[#allocation4 + $0x3] sm:$0x1] %vm275_vm2, %v299_v9  ;;  %v307_v10 = vld [vmem:[%s306_s24] sm:$0x1]  ;;  %s344_s25 = sadd.s32 9, %s1224_s11  ;;  %s314_s28 = scalar_lea.vmem [#allocation2], %s1242_s15 }
  0x97   : > { %308 = vst.msk [vmem:[#allocation4 + $0x4] sm:$0x1] %vm275_vm2, %v307_v10  ;;  %v315_v11 = vld [vmem:[%s314_s28] sm:$0x1]  ;;  %s1265_s30 = sld [smem:[#allocation7 + %s344_s25]]  ;;  %s322_s12 = scalar_lea.vmem [#allocation2], %s1245_s27 }
  0x98   : > { %316 = vst.msk [vmem:[#allocation4 + $0x5] sm:$0x1] %vm275_vm2, %v315_v11  ;;  %v323_v12 = vld [vmem:[%s322_s12] sm:$0x1]  ;;  %s352_s16 = sadd.s32 10, %s1224_s11  ;;  %s360_s18 = sadd.s32 11, %s1224_s11 }
  0x99   : > { %324 = vst.msk [vmem:[#allocation4 + $0x6] sm:$0x1] %vm275_vm2, %v323_v12  ;;  %s1272_s20 = sld [smem:[#allocation7 + %s352_s16]]  ;;  %s330_s24 = scalar_lea.vmem [#allocation2], %s1251_s7 }
  0x9a   : > { %v331_v13 = vld [vmem:[%s330_s24] sm:$0x1]  ;;  %s1275_s17 = sld [smem:[#allocation7 + %s360_s18]]  ;;  %s368_s25 = sadd.s32 12, %s1224_s11 }
  0x9b   : > { %332 = vst.msk [vmem:[#allocation4 + $0x7] sm:$0x1] %vm275_vm2, %v331_v13  ;;  %s1279_s28 = sld [smem:[#allocation7 + %s368_s25]]  ;;  %s338_s12 = scalar_lea.vmem [#allocation2], %s1258_s21 }
  0x9c   : > { %v339_v14 = vld [vmem:[%s338_s12] sm:$0x1]  ;;  %s376_s1 = sadd.s32 13, %s1224_s11  ;;  %s384_s2 = sadd.s32 14, %s1224_s11 }
  0x9d   : > { %340 = vst.msk [vmem:[#allocation4 + $0x8] sm:$0x1] %vm275_vm2, %v339_v14  ;;  %s1285_s16 = sld [smem:[#allocation7 + %s376_s1]]  ;;  %s346_s24 = scalar_lea.vmem [#allocation2], %s1265_s30 }
  0x9e   : > { %v347_v15 = vld [vmem:[%s346_s24] sm:$0x1]  ;;  %s1288_s18 = sld [smem:[#allocation7 + %s384_s2]]  ;;  %s392_s3 = sadd.s32 15, %s1224_s11 }
  0x9f   : > { %348 = vst.msk [vmem:[#allocation4 + $0x9] sm:$0x1] %vm275_vm2, %v347_v15  ;;  %s1292_s25 = sld [smem:[#allocation7 + %s392_s3]]  ;;  %s354_s12 = scalar_lea.vmem [#allocation2], %s1272_s20 }
  0xa0   : > { %v355_v16 = vld [vmem:[%s354_s12] sm:$0x1]  ;;  %s362_s4 = scalar_lea.vmem [#allocation2], %s1275_s17  ;;  %s277_s1 = scalar_lea.vmem [#allocation3], %s1227_s13 }
  0xa1   : > { %356 = vst.msk [vmem:[#allocation4 + $0xa] sm:$0x1] %vm275_vm2, %v355_v16  ;;  %v363_v17 = vld [vmem:[%s362_s4] sm:$0x1]  ;;  %s370_s2 = scalar_lea.vmem [#allocation2], %s1279_s28  ;;  %s285_s3 = scalar_lea.vmem [#allocation3], %s1230_s10 }
  0xa2   : > { %v278_v18 = vld [vmem:[%s277_s1] sm:$0x1]  ;;  %364 = vst.msk [vmem:[#allocation4 + $0xb] sm:$0x1] %vm275_vm2, %v363_v17  ;;  %s293_s11 = scalar_lea.vmem [#allocation3], %s1233_s19  ;;  %s301_s13 = scalar_lea.vmem [#allocation3], %s1236_s14 }
  0xa3   : > { %v371_v19 = vld [vmem:[%s370_s2] sm:$0x1]  ;;  %279 = vst.msk [vmem:[#allocation5] sm:$0x1] %vm275_vm2, %v278_v18  ;;  %s378_s4 = scalar_lea.vmem [#allocation2], %s1285_s16  ;;  %s309_s24 = scalar_lea.vmem [#allocation3], %s1239_s22 }
  0xa4   : > { %v286_v20 = vld [vmem:[%s285_s3] sm:$0x1]  ;;  %372 = vst.msk [vmem:[#allocation4 + $0xc] sm:$0x1] %vm275_vm2, %v371_v19  ;;  %s386_s10 = scalar_lea.vmem [#allocation2], %s1288_s18  ;;  %s317_s14 = scalar_lea.vmem [#allocation3], %s1242_s15 }
  0xa5   : > { %287 = vst.msk [vmem:[#allocation5 + $0x1] sm:$0x1] %vm275_vm2, %v286_v20  ;;  %v294_v21 = vld [vmem:[%s293_s11] sm:$0x1]  ;;  %s394_s19 = scalar_lea.vmem [#allocation2], %s1292_s25  ;;  %s325_s12 = scalar_lea.vmem [#allocation3], %s1245_s27 }
  0xa6   : > { %v379_v22 = vld [vmem:[%s378_s4] sm:$0x1]  ;;  %295 = vst.msk [vmem:[#allocation5 + $0x2] sm:$0x1] %vm275_vm2, %v294_v21  ;;  %s333_s22 = scalar_lea.vmem [#allocation3], %s1251_s7  ;;  %s341_s1 = scalar_lea.vmem [#allocation3], %s1258_s21 }
  0xa7   : > { %v302_v23 = vld [vmem:[%s301_s13] sm:$0x1]  ;;  %380 = vst.msk [vmem:[#allocation4 + $0xd] sm:$0x1] %vm275_vm2, %v379_v22  ;;  %s349_s15 = scalar_lea.vmem [#allocation3], %s1265_s30  ;;  %s357_s27 = scalar_lea.vmem [#allocation3], %s1272_s20 }
  0xa8   : > { %v387_v24 = vld [vmem:[%s386_s10] sm:$0x1]  ;;  %303 = vst.msk [vmem:[#allocation5 + $0x3] sm:$0x1] %vm275_vm2, %v302_v23  ;;  %s365_s7 = scalar_lea.vmem [#allocation3], %s1275_s17  ;;  %s373_s2 = scalar_lea.vmem [#allocation3], %s1279_s28 }
  0xa9   : > { %v310_v25 = vld [vmem:[%s309_s24] sm:$0x1]  ;;  %388 = vst.msk [vmem:[#allocation4 + $0xe] sm:$0x1] %vm275_vm2, %v387_v24  ;;  %s381_s21 = scalar_lea.vmem [#allocation3], %s1285_s16  ;;  %s389_s30 = scalar_lea.vmem [#allocation3], %s1288_s18 }
  0xaa   : > { %v395_v26 = vld [vmem:[%s394_s19] sm:$0x1]  ;;  %311 = vst.msk [vmem:[#allocation5 + $0x4] sm:$0x1] %vm275_vm2, %v310_v25  ;;  %s397_s3 = scalar_lea.vmem [#allocation3], %s1292_s25  ;;  %v400_v38 = vld [vmem:[#allocation4] sm:$0xff] }
  0xab   : > { %v318_v27 = vld [vmem:[%s317_s14] sm:$0x1]  ;;  %396 = vst.msk [vmem:[#allocation4 + $0xf] sm:$0x1] %vm275_vm2, %v395_v26  ;;  %s1008_s17 = smov 96   ;;  %s1434_s20 = scalar_lea.vmem [#allocation8], %s1207_s29 }
  0xac   : > { %319 = vst.msk [vmem:[#allocation5 + $0x5] sm:$0x1] %vm275_vm2, %v318_v27  ;;  %v326_v28 = vld [vmem:[%s325_s12] sm:$0x1]  ;;  %v464_v43 = vld [vmem:[%s1434_s20] sm:$0xff]  ;;  %s1009_s29 = smov 64  }
  0xad   : > { %v334_v29 = vld [vmem:[%s333_s22] sm:$0x1]  ;;  %327 = vst.msk [vmem:[#allocation5 + $0x6] sm:$0x1] %vm275_vm2, %v326_v28  ;;  %s1010_s28 = smov 32   ;;  %p682_p13 = scmp.ne.s32.totalorder %s1079_s0, 2 }
  0xae   : > { %335 = vst.msk [vmem:[#allocation5 + $0x7] sm:$0x1] %vm275_vm2, %v334_v29  ;;  %v342_v30 = vld [vmem:[%s341_s1] sm:$0x1] }
  0xaf   : > { %v350_v31 = vld [vmem:[%s349_s15] sm:$0x1]  ;;  %343 = vst.msk [vmem:[#allocation5 + $0x8] sm:$0x1] %vm275_vm2, %v342_v30 }
  0xb0   : > { %351 = vst.msk [vmem:[#allocation5 + $0x9] sm:$0x1] %vm275_vm2, %v350_v31  ;;  %v358_v32 = vld [vmem:[%s357_s27] sm:$0x1] }
  0xb1   : > { %v366_v33 = vld [vmem:[%s365_s7] sm:$0x1]  ;;  %359 = vst.msk [vmem:[#allocation5 + $0xa] sm:$0x1] %vm275_vm2, %v358_v32 }
  0xb2   : > { %367 = vst.msk [vmem:[#allocation5 + $0xb] sm:$0x1] %vm275_vm2, %v366_v33  ;;  %v374_v34 = vld [vmem:[%s373_s2] sm:$0x1]  ;;  %v401_v39 = vld [vmem:[#allocation4 + $0x8] sm:$0xff] }
  0xb3   : > { %v382_v35 = vld [vmem:[%s381_s21] sm:$0x1]  ;;  %375 = vst.msk [vmem:[#allocation5 + $0xc] sm:$0x1] %vm275_vm2, %v374_v34  ;;  %v402_v40 = vpack.c.bf16 %v401_v39, %v400_v38 }
  0xb4   : > { %383 = vst.msk [vmem:[#allocation5 + $0xd] sm:$0x1] %vm275_vm2, %v382_v35  ;;  %v390_v36 = vld [vmem:[%s389_s30] sm:$0x1] }
  0xb5   : > { %v398_v37 = vld [vmem:[%s397_s3] sm:$0x1]  ;;  %391 = vst.msk [vmem:[#allocation5 + $0xe] sm:$0x1] %vm275_vm2, %v390_v36  ;;  %v486_v41 = vld [vmem:[#allocation5] sm:$0xff]  ;;  %697 = vmatmul.mubr.msk.bf16.vlgmr.msra.gmra.mrb[0].mxu0 %vm419_vm3, %v402_v40 }
  0xb6   : > { %399 = vst.msk [vmem:[#allocation5 + $0xf] sm:$0x1] %vm275_vm2, %v398_v37  ;;  %488 = vrot.lane.b32.xlu0 %v486_v41, %s1008_s17 }
  0xbd   : > { %v504_v42 = vld [vmem:[#allocation5 + $0x8] sm:$0xff] }
  0xbe   : > { %506 = vrot.lane.b32.xlu0 %v504_v42, %s1008_s17 }
 0x128   : > { %v489_v59 = vpop.permute.xlu0 %488 }
 0x130   : > { %v507_v62 = vpop.permute.xlu0 %506 }
 0x188   : > { %v457_v44 = vpop.f32.mrb[0].mxu0 }
 0x189   : > { %v479_v45 = vadd.f32 %v464_v43, %v457_v44  ;;  %v698_v46 = vpop.f32.mrb[1].mxu0 }
 0x18a   : > { %v460_v47 = vpop.f32.mrb[2].mxu0 }
 0x18b   : > { %v680_v48 = vmul.f32 -1.442695, %v479_v45  ;;  %v465_v49 = vadd.f32 %v460_v47, %v457_v44  ;;  %v497_v50 = vadd.f32 %v464_v43, %v460_v47  ;;  %v699_v51 = vpop.f32.mrb[3].mxu0 }
 0x18d   : > { %785 = vpow2.f32 %v680_v48  ;;  %v466_v52 = vadd.f32 %v465_v49, %v464_v43  ;;  %v681_v53 = vmul.f32 -1.442695, %v497_v50 }
 0x18f   : > { %787 = vtanh.f32 %v466_v52  ;;  %v679_v1 = vmul.f32 -1.442695, %v466_v52 }
 0x190   : > { %789 = vpow2.f32 %v681_v53 }
 0x197   : > { %v786_v54 = vpop.eup %785 }
 0x198   : > { %v483_v55 = vadd.f32 1.0, %v786_v54 }
 0x199   : > { %v788_v56 = vpop.eup %787 }
 0x19a   : > { %v790_v57 = vpop.eup %789  ;;  %791 = vrcp.f32 %v483_v55  ;;  %475 = vrot.lane.b32.xlu1 %v788_v56, %s1009_s29 }
 0x19b   : > { %v501_v58 = vadd.f32 1.0, %v790_v57 }
 0x19d   : > { %793 = vrcp.f32 %v501_v58 }
 0x19e   : > { %795 = vpow2.f32 %v679_v1 }
 0x1a4   : > { %v792_v60 = vpop.eup %791 }
 0x1a5   : > { %v491_v61 = vmul.f32 %v792_v60, %v489_v59 }
 0x1a7   : > { %v794_v63 = vpop.eup %793  ;;  %493 = vrot.lane.b32.xlu1 %v491_v61, %s1010_s28 }
 0x1a8   : > { %v509_v0 = vmul.f32 %v794_v63, %v507_v62  ;;  %v796_v2 = vpop.eup %795 }
 0x1a9   : > { %v470_v3 = vadd.f32 1.0, %v796_v2 }
 0x1aa   : > { %511 = vrot.lane.b32.xlu0 %v509_v0, %s1010_s28 }
 0x1ab   : > { %797 = vrcp.f32 %v470_v3 }
 0x1b5   : > { %v798_v5 = vpop.eup %797 }
 0x20c   : > { %v476_v4 = vpop.permute.xlu1 %475 }
 0x20d   : > { %v478_v6 = vmul.f32 %v798_v5, %v476_v4 }
 0x219   : > { %v494_v7 = vpop.permute.xlu1 %493 }
 0x21a   : > { %v496_v8 = vadd.f32 %v494_v7, %v478_v6 }
 0x21c   : > { %v512_v9 = vpop.permute.xlu0 %511 }
 0x21d   : > { %v514_v10 = vadd.f32 %v512_v9, %v496_v8 }
 0x21f   : > { %799 = vtanh.f32 %v514_v10  ;;  %526 = vst.msk [vmem:[#allocation3] sm:$0xff] %vm419_vm3, %v514_v10  ;;  %532 = vst.msk [vmem:[#allocation15] sm:$0xff] (!%p682_p13), %vm419_vm3, %v514_v10 }
 0x229   : > { %v800_v11 = vpop.eup %799 }
 0x22a   : > { %517 = vrot.lane.b32.xlu1 %v800_v11, %s1010_s28 }
 0x29c   : > { %v518_v12 = vpop.permute.xlu1 %517 }
 0x29d   : > { %v520_v13 = vmul.f32 %v798_v5, %v518_v12 }
 0x29f   : > { %522 = vrot.lane.b32.xlu0 %v520_v13, %s1008_s17 }
 0x30c   : > { %530 = sbr.rel (%p682_p13) target bundleno = 787 (0x313), region = 56 }
 0x311   : > { %v523_v14 = vpop.permute.xlu0 %522 }
 0x312   : > { %525 = vst.msk [vmem:[#allocation2] sm:$0xff] %vm419_vm3, %v523_v14  ;;  %531 = vst.msk [vmem:[#allocation14] sm:$0xff] (!%p682_p13), %vm419_vm3, %v523_v14 }
 0x313 PF: > { %p734_p12 = scmp.eq.s32.totalorder %s1079_s0, 2  ;;  %s1011_s16 = smov [#allocation14]  }
 0x314   : > { %s540_s18 = sshll.u32 %s1011_s16, 4  ;;  %s1012_s25 = smov [#allocation15]   ;;  %s541_s18 = int_to_ptr.vmem [resolvable:$true] %s540_s18 }
 0x315   : > { %s551_s11 = sshll.u32 %s1012_s25, 4  ;;  %s897_s4 = scalar_lea.vmem %s541_s18, 128  ;;  %s552_s11 = int_to_ptr.vmem [resolvable:$true] %s551_s11 }
 0x316   : > { %p898_p4 = scmp.ne.s32.totalorder %s541_s18, %s897_s4  ;;  %p904_p9 = scmp.lt.s32.totalorder %s541_s18, %s541_s18 }
 0x317   : > { %p905_p1 = scmp.lt.s32.totalorder %s897_s4, %s897_s4 }
 0x318   : > { %p899_p7 = pnand %p898_p4, %p734_p12 }
 0x319   : > { %p906_p3 = por %p905_p1, %p904_p9 }
 0x31a   : > { %p900_p8 = pneg %p899_p7 }
 0x31c   : > { %p907_p5 = pnand %p906_p3, %p900_p8 }
 0x31e   : > { %910 = shalt.err (!%p907_p5)
}
 0x31f   : > { %s911_s24 = scalar_lea.hbm %s1412_s5, 128 }
 0x320   : > { %p912_p2 = scmp.ne.s32.totalorder %s1412_s5, %s911_s24  ;;  %p917_p11 = scmp.lt.u32.totalorder %s911_s24, %s1412_s5 }
 0x322   : > { %p913_p0 = pnand %p912_p2, %p734_p12 }
 0x324   : > { %p914_p6 = pneg %p913_p0 }
 0x326   : > { %p919_p10 = pnand %p917_p11, %p914_p6 }
 0x328   : > { %922 = shalt.err (!%p919_p10)
}
 0x329   : > { %711 = dma.vmem_to_hbm [thread:$0]  (%p734_p12), %s541_s18, 128, %s1412_s5, [#allocation10]  }
 0x32a   : > { %s923_s27 = scalar_lea.vmem %s552_s11, 128  ;;  %p930_p8 = scmp.lt.s32.totalorder %s552_s11, %s552_s11 }
 0x32b   : > { %p924_p13 = scmp.ne.s32.totalorder %s552_s11, %s923_s27  ;;  %p931_p9 = scmp.lt.s32.totalorder %s923_s27, %s923_s27 }
 0x32d   : > { %p925_p4 = pnand %p924_p13, %p734_p12  ;;  %p932_p1 = por %p931_p9, %p930_p8 }
 0x32f   : > { %p926_p7 = pneg %p925_p4 }
 0x331   : > { %p933_p3 = pnand %p932_p1, %p926_p7 }
 0x333   : > { %936 = shalt.err (!%p933_p3)
}
 0x334   : > { %s937_s21 = scalar_lea.hbm %s1413_s6, 128 }
 0x335   : > { %p938_p5 = scmp.ne.s32.totalorder %s1413_s6, %s937_s21  ;;  %p943_p6 = scmp.lt.u32.totalorder %s937_s21, %s1413_s6 }
 0x337   : > { %p939_p2 = pnand %p938_p5, %p734_p12 }
 0x339   : > { %p940_p0 = pneg %p939_p2 }
 0x33b   : > { %p945_p11 = pnand %p943_p6, %p940_p0 }
 0x33d   : > { %948 = shalt.err (!%p945_p11)
}
 0x33e   : > { %713 = dma.vmem_to_hbm [thread:$0]  (%p734_p12), %s552_s11, 128, %s1413_s6, [#allocation16]  }
 0x33f   : > { %976 = dma.done.wait (%p734_p12), [#allocation10], 128  }
 0x340   : > { %978 = vsyncadd (%p734_p12), [#allocation10], 4294967168 }
 0x341   : > { %980 = dma.done.wait (%p734_p12), [#allocation16], 128  }
 0x342   : > { %982 = vsyncadd (%p734_p12), [#allocation16], 4294967168 }
 0x343 PF: > { %p24_p10 = scmp.ge.s32.totalorder %s1154_s23, 5   ;;  %s1435_s7 = smov %s989_s8 }
 0x344   : > { %s1436_s8 = smov %s993_s9  ;;  %s1437_s9 = smov %s1165_s26 }
 0x345   : > { %s1438_s10 = smov %s1154_s23  ;;  %26 = sbr.rel (!%p24_p10) target bundleno = 19 (0x13), region = 129 }
 0x34c   :  { %568 = vsyncpa [#allocation9], 1 }
 0x34d   :  { %570 = vsyncpa [#allocation9 + $0x1], 1 }
 0x34e   :  { %571 = vsyncpa [#allocation12], 1 }
 0x34f   :  { %572 = vsyncpa [#allocation10], 1 }
 0x350   :  { %574 = vsyncpa [#allocation10 + $0x1], 1 }
 0x351   :  { %575 = vsyncpa [#allocation16], 1 }

</bundles_post_ra>
